<compile_context>
chip_gen: v7x
topology: tpu7x:2x2x1
jax: 0.10.0
libtpu: 0.0.40
codegen_flags: <defaults>
</compile_context>

<pallas_src>
import functools

import jax
import jax.numpy as jnp
from jax import lax
from jax.experimental import pallas as pl
from jax.experimental.pallas import tpu as pltpu


# ----------------------------- Pallas kernel -------------------------------
def _conv_gn_relu_kernel(patch_ref, w_ref, b_ref, gamma_ref, beta_ref,
                         *rest, p_real, cpg, eps):
    # patch_ref: (1, Ppad, Kpad) bf16   im2col patches of one sample (zero-padded)
    # w_ref:     (Kpad, Cpad)    bf16   conv weight as matmul operand (zero-padded)
    # b/gamma/beta_ref: (1, Cpad) f32   (zero in the padded channels)
    # rest: [M (Cpad,Gpad), MT (Gpad,Cpad)]? , o_ref (1, Ppad, Cpad) f32
    if cpg == 1:
        (o_ref,) = rest
        m_ref = mt_ref = None
    else:
        m_ref, mt_ref, o_ref = rest

    patches = patch_ref[0]                       # (Ppad, Kpad) bf16
    w = w_ref[...]                               # (Kpad, Cpad) bf16
    bias = b_ref[...]                            # (1, Cpad) f32

    # Convolution as a single bf16 MXU matmul with f32 accumulation.
    y = jnp.dot(patches, w, preferred_element_type=jnp.float32) + bias  # (Ppad, Cpad)

    p_pad = y.shape[0]
    n_pad_rows = p_pad - p_real

    # GroupNorm statistics: per-channel sums (sublane reductions on full vregs).
    ysum = jnp.sum(y, axis=0, keepdims=True)     # (1, Cpad)
    ysq = jnp.sum(y * y, axis=0, keepdims=True)  # (1, Cpad)
    if n_pad_rows:
        # Padded patch rows are all-zero, so their conv output is exactly
        # `bias`; remove that known contribution instead of masking (P,C) ops.
        ysum = ysum - n_pad_rows * bias
        ysq = ysq - n_pad_rows * (bias * bias)

    if cpg == 1:
        # num_groups == Cout: per-channel sums ARE the group sums — no
        # lane->sublane reshape / broadcast needed.
        inv_cnt = 1.0 / float(p_real)
        mean_c = ysum * inv_cnt                  # (1, Cpad)
        var_c = ysq * inv_cnt - mean_c * mean_c
    else:
        # Gather per-group sums / scatter back per-channel via tiny MXU
        # matmuls against a 0/1 indicator matrix (padded channels map nowhere).
        m = m_ref[...]                           # (Cpad, Gpad)
        mt = mt_ref[...]                         # (Gpad, Cpad)
        inv_cnt = 1.0 / float(p_real * cpg)
        mean_g = jnp.dot(ysum, m, preferred_element_type=jnp.float32) * inv_cnt
        msq_g = jnp.dot(ysq, m, preferred_element_type=jnp.float32) * inv_cnt
        var_g = msq_g - mean_g * mean_g
        mean_c = jnp.dot(mean_g, mt, preferred_element_type=jnp.float32)
        var_c = jnp.dot(var_g, mt, preferred_element_type=jnp.float32)

    # Fold the affine into a per-channel scale/shift (all on one (1,Cpad) row),
    # so the full-size epilogue is just mul + add + max.
    inv_std = lax.rsqrt(var_c + eps)
    scale = gamma_ref[...] * inv_std             # (1, Cpad)
    shift = beta_ref[...] - mean_c * scale       # (1, Cpad)
    o_ref[0] = jnp.maximum(y * scale + shift, 0.0).astype(o_ref.dtype)


# ------------------------------ JAX wrapper ---------------------------------
def _round_up(x, m):
    return (x + m - 1) // m * m


def _im2col(x_nhwc, kh, kw, stride, padding):
    x_pad = jnp.pad(x_nhwc, ((0, 0), (padding, padding), (padding, padding), (0, 0)))
    N, Hp, Wp, C = x_pad.shape
    oh = (Hp - kh) // stride + 1
    ow = (Wp - kw) // stride + 1
    pieces = []
    for i in range(kh):
        for j in range(kw):
            pieces.append(
                x_pad[:, i:i + (oh - 1) * stride + 1:stride,
                      j:j + (ow - 1) * stride + 1:stride, :])
    # (N, oh, ow, kh*kw*C), ordering: (i, j) outer, channel inner
    patches = jnp.concatenate(pieces, axis=-1)
    return patches, oh, ow


def conv_gn_relu(x_nchw, weight, bias, gamma, beta,
                 stride=1, padding=0, num_groups=32, eps=1e-5):
    """Forward pass of ConvGnRelu. x_nchw: (N, Cin, H, W). Returns NCHW f32."""
    N, Cin, H, W = x_nchw.shape
    Cout, _, KH, KW = weight.shape
    assert Cout % num_groups == 0
    cpg = Cout // num_groups

    x_nhwc = jnp.transpose(x_nchw, (0, 2, 3, 1)).astype(jnp.float32)
    patches, OH, OW = _im2col(x_nhwc, KH, KW, stride, padding)
    P = OH * OW
    K = KH * KW * Cin
    patches = patches.reshape(N, P, K)

    # Layout-friendly padding: lane dims (K, Cout) -> multiples of 128,
    # sublane dim (P) -> multiple of 16 (bf16 packs 16 rows per vreg).
    P_pad = _round_up(P, 16)
    K_pad = _round_up(K, 128)
    C_pad = _round_up(Cout, 128)

    patches = jnp.pad(patches, ((0, 0), (0, P_pad - P), (0, K_pad - K)))
    patches = patches.astype(jnp.bfloat16)

    # Weight (Cout, Cin, KH, KW) -> (KH, KW, Cin, Cout) -> (K, Cout), matching
    # the (i, j, ci) patch ordering, then zero-pad to (K_pad, C_pad).
    w_mat = jnp.transpose(weight, (2, 3, 1, 0)).reshape(K, Cout).astype(jnp.float32)
    w_mat = jnp.pad(w_mat, ((0, K_pad - K), (0, C_pad - Cout))).astype(jnp.bfloat16)

    cpad = C_pad - Cout
    b2 = jnp.pad(bias.astype(jnp.float32), (0, cpad)).reshape(1, C_pad)
    g2 = jnp.pad(gamma.astype(jnp.float32), (0, cpad)).reshape(1, C_pad)
    be2 = jnp.pad(beta.astype(jnp.float32), (0, cpad)).reshape(1, C_pad)

    in_arrays = [patches, w_mat, b2, g2, be2]
    in_specs = [
        pl.BlockSpec((1, P_pad, K_pad), lambda n: (n, 0, 0)),
        pl.BlockSpec((K_pad, C_pad), lambda n: (0, 0)),
        pl.BlockSpec((1, C_pad), lambda n: (0, 0)),
        pl.BlockSpec((1, C_pad), lambda n: (0, 0)),
        pl.BlockSpec((1, C_pad), lambda n: (0, 0)),
    ]

    if cpg > 1:
        # Indicator matrix mapping real channels -> their real group
        # (padded channels / padded groups get all-zero rows/columns).
        G_pad = _round_up(num_groups, 128)
        ch = jnp.arange(C_pad)
        grp = ch // cpg
        m = jnp.where((ch < Cout)[:, None]
                      & (grp[:, None] == jnp.arange(G_pad)[None, :]),
                      1.0, 0.0).astype(jnp.float32)          # (C_pad, G_pad)
        in_arrays += [m, m.T]
        in_specs += [pl.BlockSpec((C_pad, G_pad), lambda n: (0, 0)),
                     pl.BlockSpec((G_pad, C_pad), lambda n: (0, 0))]

    kernel = functools.partial(_conv_gn_relu_kernel, p_real=P, cpg=cpg, eps=eps)

    out = pl.pallas_call(
        kernel,
        out_shape=jax.ShapeDtypeStruct((N, P_pad, C_pad), jnp.float32),
        grid_spec=pltpu.PrefetchScalarGridSpec(
            num_scalar_prefetch=0,
            grid=(N,),
            in_specs=in_specs,
            out_specs=pl.BlockSpec((1, P_pad, C_pad), lambda n: (n, 0, 0)),
        ),
        compiler_params=pltpu.CompilerParams(
            dimension_semantics=("parallel",),      # shards over 2 TCs on v7x
            vmem_limit_bytes=64 * 1024 * 1024),     # headroom for larger tiles
    )(*in_arrays)

    # Strip padding: (N, P_pad, C_pad) -> (N, OH, OW, Cout) -> NCHW
    out = out[:, :P, :Cout].reshape(N, OH, OW, Cout)
    return jnp.transpose(out, (0, 3, 1, 2))


# --------------------------- pure-JAX reference ------------------------------
def _reference(x_nchw, weight, bias, gamma, beta,
               stride=1, padding=0, num_groups=32, eps=1e-5,
               conv_dtype=jnp.float32):
    y = lax.conv_general_dilated(
        x_nchw.astype(conv_dtype), weight.astype(conv_dtype),
        window_strides=(stride, stride),
        padding=[(padding, padding), (padding, padding)],
        dimension_numbers=("NCHW", "OIHW", "NCHW"),
        preferred_element_type=jnp.float32)
    y = y + bias.reshape(1, -1, 1, 1).astype(jnp.float32)
    N, C, H, W = y.shape
    yg = y.reshape(N, num_groups, C // num_groups, H, W)
    mean = jnp.mean(yg, axis=(2, 3, 4), keepdims=True)
    var = jnp.mean((yg - mean) ** 2, axis=(2, 3, 4), keepdims=True)
    yn = ((yg - mean) * lax.rsqrt(var + eps)).reshape(N, C, H, W)
    yn = yn * gamma.reshape(1, -1, 1, 1) + beta.reshape(1, -1, 1, 1)
    return jnp.maximum(yn, 0.0)


# --------------------------------- main --------------------------------------
if __name__ == "__main__":
    # Module config (GroupNorm(32, out_channel) forces out_channel % 32 == 0)
    in_channel, out_channel = 4, 32
    kernel_size, stride, padding = 3, 1, 0
    N, H, W = 2, 16, 16

    key = jax.random.PRNGKey(0)
    k_x, k_w = jax.random.split(key)

    x = jax.random.normal(k_x, (N, in_channel, H, W), dtype=jnp.float32)

    # Conv2d params: kaiming_uniform_(weight, a=1) -> bound = sqrt(3 / fan_in)
    fan_in = in_channel * kernel_size * kernel_size
    bound = (3.0 / fan_in) ** 0.5
    conv_w = jax.random.uniform(
        k_w, (out_channel, in_channel, kernel_size, kernel_size),
        minval=-bound, maxval=bound, dtype=jnp.float32)
    conv_b = jnp.zeros((out_channel,), jnp.float32)          # constant_(bias, 0)

    # GroupNorm params (PyTorch defaults: weight=1, bias=0)
    gn_gamma = jnp.ones((out_channel,), jnp.float32)
    gn_beta = jnp.zeros((out_channel,), jnp.float32)

    out = conv_gn_relu(x, conv_w, conv_b, gn_gamma, gn_beta,
                       stride=stride, padding=padding)
    out = jax.block_until_ready(out)

    # Precision-matched reference (same bf16 conv operands, f32 accumulation).
    ref_bf16 = jax.block_until_ready(
        _reference(x, conv_w, conv_b, gn_gamma, gn_beta,
                   stride=stride, padding=padding, conv_dtype=jnp.bfloat16))
    # Full-f32 reference (canonical semantics); looser tol covers bf16 quantization.
    ref_f32 = jax.block_until_ready(
        _reference(x, conv_w, conv_b, gn_gamma, gn_beta,
                   stride=stride, padding=padding, conv_dtype=jnp.float32))

    assert out.shape == ref_f32.shape == (N, out_channel, H - 2, W - 2)
    assert jnp.allclose(out, ref_bf16, atol=2e-3, rtol=2e-3), \
        float(jnp.max(jnp.abs(out - ref_bf16)))
    assert jnp.allclose(out, ref_f32, atol=5e-2, rtol=5e-2), \
        float(jnp.max(jnp.abs(out - ref_f32)))

    print("KERNEL_OK")
</pallas_src>

<mosaic_0001>
module attributes {stable_mosaic.version = 11 : i64} {
  func.func @_conv_gn_relu_kernel(%arg0: i32, %arg1: memref<1x208x128xbf16, #tpu.memory_space<vmem>>, %arg2: memref<128x128xbf16, #tpu.memory_space<vmem>>, %arg3: memref<1x128xf32, #tpu.memory_space<vmem>>, %arg4: memref<1x128xf32, #tpu.memory_space<vmem>>, %arg5: memref<1x128xf32, #tpu.memory_space<vmem>>, %arg6: memref<1x208x128xf32, #tpu.memory_space<vmem>>) attributes {dimension_semantics = [#tpu.dimension_semantics<parallel>], iteration_bounds = array<i64: 2>, scalar_prefetch = 0 : i64, scratch_operands = 0 : i64, tpu.core_type = #tpu.core_type<tc>, window_params = [{transform_indices = @transform_0, window_bounds = array<i64: 1, 208, 128>}, {pipeline_mode = #tpu.pipeline_mode<synchronous>, transform_indices = @transform_1, window_bounds = array<i64: 128, 128>}, {pipeline_mode = #tpu.pipeline_mode<synchronous>, transform_indices = @transform_2, window_bounds = array<i64: 1, 128>}, {pipeline_mode = #tpu.pipeline_mode<synchronous>, transform_indices = @transform_3, window_bounds = array<i64: 1, 128>}, {pipeline_mode = #tpu.pipeline_mode<synchronous>, transform_indices = @transform_4, window_bounds = array<i64: 1, 128>}, {transform_indices = @transform_5, window_bounds = array<i64: 1, 208, 128>}]} {
    %c0 = arith.constant 0 : index
    %c0_0 = arith.constant 0 : index
    %c0_1 = arith.constant 0 : index
    %0 = vector.load %arg1[%c0, %c0_0, %c0_1] : memref<1x208x128xbf16, #tpu.memory_space<vmem>>, vector<1x208x128xbf16>
    %1 = vector.shape_cast %0 : vector<1x208x128xbf16> to vector<208x128xbf16>
    %c0_2 = arith.constant 0 : index
    %c0_3 = arith.constant 0 : index
    %2 = vector.load %arg2[%c0_2, %c0_3] : memref<128x128xbf16, #tpu.memory_space<vmem>>, vector<128x128xbf16>
    %c0_4 = arith.constant 0 : index
    %c0_5 = arith.constant 0 : index
    %3 = vector.load %arg3[%c0_4, %c0_5] : memref<1x128xf32, #tpu.memory_space<vmem>>, vector<1x128xf32>
    %cst = arith.constant dense<0.000000e+00> : vector<208x128xf32>
    %4 = tpu.matmul %1, %2, %cst {dimension_numbers = #tpu.dot_dimension_numbers<[1], [0], [0], [1], [0, 0, 1, 1], [], []>} : vector<208x128xbf16>, vector<128x128xbf16>, vector<208x128xf32> -> vector<208x128xf32>
    %5 = vector.broadcast %3 : vector<1x128xf32> to vector<208x128xf32>
    %6 = arith.addf %4, %5 : vector<208x128xf32>
    %cst_6 = arith.constant dense<0.000000e+00> : vector<128xf32>
    %7 = vector.multi_reduction <add>, %6, %cst_6 [0] : vector<208x128xf32> to vector<128xf32>
    %8 = vector.shape_cast %7 : vector<128xf32> to vector<1x128xf32>
    %9 = arith.mulf %6, %6 : vector<208x128xf32>
    %cst_7 = arith.constant dense<0.000000e+00> : vector<128xf32>
    %10 = vector.multi_reduction <add>, %9, %cst_7 [0] : vector<208x128xf32> to vector<128xf32>
    %11 = vector.shape_cast %10 : vector<128xf32> to vector<1x128xf32>
    %cst_8 = arith.constant 1.200000e+01 : f32
    %12 = vector.broadcast %cst_8 : f32 to vector<1x128xf32>
    %13 = arith.mulf %12, %3 : vector<1x128xf32>
    %14 = arith.subf %8, %13 : vector<1x128xf32>
    %15 = arith.mulf %3, %3 : vector<1x128xf32>
    %cst_9 = arith.constant 1.200000e+01 : f32
    %16 = vector.broadcast %cst_9 : f32 to vector<1x128xf32>
    %17 = arith.mulf %16, %15 : vector<1x128xf32>
    %18 = arith.subf %11, %17 : vector<1x128xf32>
    %cst_10 = arith.constant 0.00510204071 : f32
    %19 = vector.broadcast %cst_10 : f32 to vector<1x128xf32>
    %20 = arith.mulf %14, %19 : vector<1x128xf32>
    %cst_11 = arith.constant 0.00510204071 : f32
    %21 = vector.broadcast %cst_11 : f32 to vector<1x128xf32>
    %22 = arith.mulf %18, %21 : vector<1x128xf32>
    %23 = arith.mulf %20, %20 : vector<1x128xf32>
    %24 = arith.subf %22, %23 : vector<1x128xf32>
    %cst_12 = arith.constant 9.99999974E-6 : f32
    %25 = vector.broadcast %cst_12 : f32 to vector<1x128xf32>
    %26 = arith.addf %24, %25 : vector<1x128xf32>
    %27 = math.rsqrt %26 : vector<1x128xf32>
    %c0_13 = arith.constant 0 : index
    %c0_14 = arith.constant 0 : index
    %28 = vector.load %arg4[%c0_13, %c0_14] : memref<1x128xf32, #tpu.memory_space<vmem>>, vector<1x128xf32>
    %29 = arith.mulf %28, %27 : vector<1x128xf32>
    %c0_15 = arith.constant 0 : index
    %c0_16 = arith.constant 0 : index
    %30 = vector.load %arg5[%c0_15, %c0_16] : memref<1x128xf32, #tpu.memory_space<vmem>>, vector<1x128xf32>
    %31 = arith.mulf %20, %29 : vector<1x128xf32>
    %32 = arith.subf %30, %31 : vector<1x128xf32>
    %33 = vector.broadcast %29 : vector<1x128xf32> to vector<208x128xf32>
    %34 = arith.mulf %6, %33 : vector<208x128xf32>
    %35 = vector.broadcast %32 : vector<1x128xf32> to vector<208x128xf32>
    %36 = arith.addf %34, %35 : vector<208x128xf32>
    %cst_17 = arith.constant 0.000000e+00 : f32
    %37 = vector.broadcast %cst_17 : f32 to vector<208x128xf32>
    %38 = arith.maximumf %36, %37 : vector<208x128xf32>
    %c0_18 = arith.constant 0 : index
    %c0_19 = arith.constant 0 : index
    %c0_20 = arith.constant 0 : index
    %39 = vector.load %arg6[%c0_18, %c0_19, %c0_20] : memref<1x208x128xf32, #tpu.memory_space<vmem>>, vector<1x208x128xf32>
    %40 = vector.shape_cast %39 : vector<1x208x128xf32> to vector<208x128xf32>
    %41 = vector.shape_cast %38 : vector<208x128xf32> to vector<1x208x128xf32>
    tpu.vector_store %arg6[%c0_18, %c0_19, %c0_20], %41 {strides = array<i32>} : memref<1x208x128xf32, #tpu.memory_space<vmem>>, vector<1x208x128xf32>,
    return
  }
  func.func @transform_0(%arg0: i32) -> (i32, i32, i32) {
    %c0_i32 = arith.constant 0 : i32
    %c0_i32_0 = arith.constant 0 : i32
    %c0_i32_1 = arith.constant 0 : i32
    return %arg0, %c0_i32, %c0_i32_0 : i32, i32, i32
  }
  func.func @transform_1(%arg0: i32) -> (i32, i32) {
    %c0_i32 = arith.constant 0 : i32
    %c0_i32_0 = arith.constant 0 : i32
    %c0_i32_1 = arith.constant 0 : i32
    return %c0_i32, %c0_i32_0 : i32, i32
  }
  func.func @transform_2(%arg0: i32) -> (i32, i32) {
    %c0_i32 = arith.constant 0 : i32
    %c0_i32_0 = arith.constant 0 : i32
    %c0_i32_1 = arith.constant 0 : i32
    return %c0_i32, %c0_i32_0 : i32, i32
  }
  func.func @transform_3(%arg0: i32) -> (i32, i32) {
    %c0_i32 = arith.constant 0 : i32
    %c0_i32_0 = arith.constant 0 : i32
    %c0_i32_1 = arith.constant 0 : i32
    return %c0_i32, %c0_i32_0 : i32, i32
  }
  func.func @transform_4(%arg0: i32) -> (i32, i32) {
    %c0_i32 = arith.constant 0 : i32
    %c0_i32_0 = arith.constant 0 : i32
    %c0_i32_1 = arith.constant 0 : i32
    return %c0_i32, %c0_i32_0 : i32, i32
  }
  func.func @transform_5(%arg0: i32) -> (i32, i32, i32) {
    %c0_i32 = arith.constant 0 : i32
    %c0_i32_0 = arith.constant 0 : i32
    %c0_i32_1 = arith.constant 0 : i32
    return %arg0, %c0_i32, %c0_i32_0 : i32, i32, i32
  }
}

</mosaic_0001>

<bundles_post_ra>
// kernel: tpu_custom_call.1
= control target key start
LH: loop header
LB: loop body
LE: loop exit
PB: predicated region body
PF: predicated region fallthrough
CT: control target
= control target key end

     0   :  { %10 = vsyncpa [#allocation3], 0  ;;  %s2074_s0 = inlined_call_operand.hbm [shape: bf16[2,208,128], index: 0, kind: input, shape index: {}]   ;;  %s2075_s1 = inlined_call_operand.hbm [shape: bf16[128,128], index: 1, kind: input, shape index: {}]   ;;  %s2076_s2 = inlined_call_operand.hbm [shape: f32[1,128], index: 2, kind: input, shape index: {}]   ;;  %s2077_s3 = inlined_call_operand.hbm [shape: f32[1,128], index: 3, kind: input, shape index: {}]   ;;  %s2078_s4 = inlined_call_operand.hbm [shape: f32[1,128], index: 4, kind: input, shape index: {}]   ;;  %s2079_s5 = inlined_call_operand.hbm [shape: f32[2,208,128], index: 5, kind: output, shape index: {}]  }
   0x1   :  { %12 = vsyncpa [#allocation3 + $0x1], 0 }
   0x2   :  { %13 = vsyncpa [#allocation6], 0 }
   0x3   :  { %14 = vsyncpa [#allocation9], 0 }
   0x4   :  { %15 = vsyncpa [#allocation4], 0 }
   0x5   :  { %17 = vsyncpa [#allocation4 + $0x1], 0  ;;  %s1476_s18 = smov 0   ;;  %s1478_s19 = smov 0  }
   0x6   :  { %s1480_s20 = smov 0   ;;  %s1482_s21 = smov 0  }
   0x7 LB: > { %s1497_s22 = sadd.s32 4294967295, %s1432_s21   ;;  %s953_s23 = sadd.s32 4294967294, %s1432_s21   ;;  %s1432_s21 = sphi %s1482_s21, %s2104_s21   ;;  %s1428_s20 = sphi %s1480_s20, %s2103_s20   ;;  %s1424_s19 = sphi %s1478_s19, %s2102_s19   ;;  %s1420_s18 = sphi %s1476_s18, %s2101_s18  }
   0x8   : > { %p43_p0 = scmp.ne.s32.totalorder %s1424_s19, %s1420_s18  ;;  %p2080_p1 = scmp.eq.s32.totalorder %s1497_s22, 0 }
   0x9   : > { %p157_p3 = scmp.eq.s32.totalorder %s953_s23, 1  ;;  %p954_p5 = scmp.ge.s32.totalorder %s1432_s21, 1 }
   0xa   : > { %p1506_p4 = por %p2080_p1, %p43_p0  ;;  %p164_p7 = scmp.lt.s32.totalorder %s1432_s21, 3 }
   0xb   : > { %p1511_p6 = por %p157_p3, %p43_p0  ;;  %s1434_s27 = smov [#allocation5]  }
   0xc   : > { %s2084_s24 = scalar_select %p1506_p4, 1, 0 }
   0xd   : > { %s2085_s25 = scalar_select %p1511_p6, 1, 0 }
   0xe   : > { %p1516_p8 = pnand %p954_p5, %p164_p7  ;;  %s176_s28 = sshll.u32 %s1434_s27, 4  ;;  %s1520_s28 = int_to_ptr.vmem [resolvable:$true] %s176_s28 }
   0xf   : > { %s1435_s30 = smov [#allocation8]   ;;  %s1436_s7 = smov [#allocation7]  }
  0x10   : > { %s2086_s26 = scalar_select %p1516_p8, 1, 0 }
  0x11   : > { %p1120_p9 = pneg %p1516_p8  ;;  %s201_s6 = sshll.u32 %s1435_s30, 4  ;;  %s1531_s6 = int_to_ptr.vmem [resolvable:$true] %s201_s6 }
  0x12   : > { %s1533_s8 = sshll.u32 %s1436_s7, 4  ;;  %s1216_s11 = scalar_lea.hbm %s2075_s1, 1024  ;;  %s191_s8 = int_to_ptr.vmem [resolvable:$true] %s1533_s8 }
  0x13   : > { %p1527_p11 = pnand %p1120_p9, %p2080_p1  ;;  %p1217_p12 = scmp.ne.s32.totalorder %s2075_s1, %s1216_s11 }
  0x14   : > { %p1223_p5 = scmp.lt.u32.totalorder %s1216_s11, %s2075_s1 }
  0x15   : > { %p1543_p13 = pneg %p1527_p11 }
  0x17   : > { %p1219_p0 = pnand %p1543_p13, %p1217_p12 }
  0x19   : > { %p1220_p3 = pneg %p1219_p0 }
  0x1b   : > { %p1225_p7 = pnand %p1223_p5, %p1220_p3 }
  0x1d   : > { %1228 = shalt.err (!%p1225_p7)
}
  0x1e   : > { %s1229_s17 = scalar_lea.vmem %s1520_s28, 1024  ;;  %p1237_p2 = scmp.lt.s32.totalorder %s1520_s28, %s1520_s28 }
  0x1f   : > { %p1230_p9 = scmp.ne.s32.totalorder %s1520_s28, %s1229_s17  ;;  %p1238_p6 = scmp.lt.s32.totalorder %s1229_s17, %s1229_s17 }
  0x21   : > { %p1232_p10 = pnand %p1230_p9, %p1543_p13  ;;  %p1239_p12 = por %p1238_p6, %p1237_p2 }
  0x23   : > { %p1233_p1 = pneg %p1232_p10 }
  0x25   : > { %p1240_p0 = pnand %p1239_p12, %p1233_p1 }
  0x27   : > { %1243 = shalt.err (!%p1240_p0)
}
  0x28   : > { %s2083_s23 = smov 64   ;;  %s1438_s27 = smov 4  }
  0x29   : > { %1123 = dma.hbm_to_vmem [thread:$0]  (!%p1527_p11), %s2075_s1, 1024, %s1520_s28, [#allocation6], %s2083_s23, %s2083_s23, %s1438_s27  }
  0x2a   : > { %s1244_s11 = scalar_lea.hbm %s2077_s3, 16 }
  0x2b   : > { %p1245_p1 = scmp.ne.s32.totalorder %s2077_s3, %s1244_s11  ;;  %p1251_p10 = scmp.lt.u32.totalorder %s1244_s11, %s2077_s3 }
  0x2d   : > { %p1247_p2 = pnand %p1245_p1, %p1543_p13 }
  0x2f   : > { %p1248_p6 = pneg %p1247_p2 }
  0x31   : > { %p1253_p3 = pnand %p1251_p10, %p1248_p6 }
  0x33   : > { %1256 = shalt.err (!%p1253_p3)
}
  0x34   : > { %s1257_s28 = scalar_lea.vmem %s1531_s6, 16  ;;  %s1264_s17 = scalar_lea.vmem %s1531_s6, 32 }
  0x35   : > { %p1258_p5 = scmp.ne.s32.totalorder %s1531_s6, %s1257_s28  ;;  %p1265_p12 = scmp.lt.s32.totalorder %s1531_s6, %s1531_s6 }
  0x36   : > { %p1266_p0 = scmp.lt.s32.totalorder %s1264_s17, %s1257_s28 }
  0x37   : > { %p1260_p7 = pnand %p1258_p5, %p1543_p13 }
  0x38   : > { %p1267_p1 = por %p1266_p0, %p1265_p12 }
  0x39   : > { %p1261_p9 = pneg %p1260_p7 }
  0x3b   : > { %p1268_p2 = pnand %p1267_p1, %p1261_p9 }
  0x3d   : > { %1271 = shalt.err (!%p1268_p2)
}
  0x3e   : > { %1129 = dma.hbm_to_vmem [thread:$0]  (!%p1527_p11), %s2077_s3, 16, %s1531_s6, [#allocation9]  }
  0x3f   : > { %s1272_s11 = scalar_lea.hbm %s2076_s2, 16 }
  0x40   : > { %p1273_p6 = scmp.ne.s32.totalorder %s2076_s2, %s1272_s11  ;;  %p1279_p5 = scmp.lt.u32.totalorder %s1272_s11, %s2076_s2 }
  0x42   : > { %p1275_p10 = pnand %p1273_p6, %p1543_p13 }
  0x44   : > { %p1276_p3 = pneg %p1275_p10 }
  0x46   : > { %p1281_p7 = pnand %p1279_p5, %p1276_p3 }
  0x48   : > { %1284 = shalt.err (!%p1281_p7)
}
  0x49   : > { %s1285_s28 = scalar_lea.vmem %s191_s8, 16  ;;  %s1292_s6 = scalar_lea.vmem %s191_s8, 32 }
  0x4a   : > { %p1286_p9 = scmp.ne.s32.totalorder %s191_s8, %s1285_s28  ;;  %p1293_p1 = scmp.lt.s32.totalorder %s191_s8, %s191_s8 }
  0x4b   : > { %p1294_p2 = scmp.lt.s32.totalorder %s1292_s6, %s1285_s28 }
  0x4c   : > { %p1288_p12 = pnand %p1286_p9, %p1543_p13 }
  0x4d   : > { %p1295_p4 = por %p1294_p2, %p1293_p1 }
  0x4e   : > { %p1289_p0 = pneg %p1288_p12 }
  0x50   : > { %p1296_p8 = pnand %p1295_p4, %p1289_p0 }
  0x52   : > { %1299 = shalt.err (!%p1296_p8)
}
  0x53   : > { %1126 = dma.hbm_to_vmem [thread:$0]  (!%p1527_p11), %s2076_s2, 16, %s191_s8, [#allocation6]  }
  0x54   : > { %s1439_s7 = smov [#allocation10]   ;;  %s1300_s12 = scalar_lea.hbm %s2078_s4, 16 }
  0x55   : > { %s212_s9 = sshll.u32 %s1439_s7, 4  ;;  %p1301_p6 = scmp.ne.s32.totalorder %s2078_s4, %s1300_s12  ;;  %s213_s9 = int_to_ptr.vmem [resolvable:$true] %s212_s9 }
  0x56   : > { %p1307_p10 = scmp.lt.u32.totalorder %s1300_s12, %s2078_s4 }
  0x57   : > { %p1303_p4 = pnand %p1301_p6, %p1543_p13 }
  0x59   : > { %p1304_p8 = pneg %p1303_p4 }
  0x5b   : > { %p1309_p3 = pnand %p1307_p10, %p1304_p8 }
  0x5d   : > { %1312 = shalt.err (!%p1309_p3)
}
  0x5e   : > { %s1313_s8 = scalar_lea.vmem %s213_s9, 16  ;;  %s1320_s6 = scalar_lea.vmem %s213_s9, 32 }
  0x5f   : > { %p1314_p5 = scmp.ne.s32.totalorder %s213_s9, %s1313_s8  ;;  %p1321_p12 = scmp.lt.s32.totalorder %s213_s9, %s213_s9 }
  0x60   : > { %p1322_p0 = scmp.lt.s32.totalorder %s1320_s6, %s1313_s8 }
  0x61   : > { %p1316_p7 = pnand %p1314_p5, %p1543_p13 }
  0x62   : > { %p1323_p1 = por %p1322_p0, %p1321_p12 }
  0x63   : > { %p1317_p9 = pneg %p1316_p7 }
  0x65   : > { %p1324_p2 = pnand %p1323_p1, %p1317_p9 }
  0x67   : > { %1327 = shalt.err (!%p1324_p2)
}
  0x68   : > { %1132 = dma.hbm_to_vmem [thread:$0]  (!%p1527_p11), %s2078_s4, 16, %s213_s9, [#allocation9]  }
  0x69   : > { %s1629_s14 = sadd.s32 1, %s1432_s21   ;;  %s30_s7 = sadd.s32 1, %s1428_s20 }
  0x6a   : > { %s27_s29 = ssub.s32 %s1432_s21, %s1629_s14  ;;  %p37_p13 = scmp.ne.s32.totalorder %s1428_s20, %s1424_s19 }
  0x6b   : > { %p28_p6 = scmp.eq.s32.totalorder %s27_s29, 0  ;;  %p38_p4 = scmp.eq.s32.totalorder %s1432_s21, 0 }
  0x6c   : > { %p2089_p8 = scmp.eq.s32.totalorder %s1497_s22, 1  ;;  %p1145_p3 = scmp.lt.s32.totalorder %s1432_s21, 2 }
  0x6d   : > { %s1645_s11 = scalar_select %p28_p6, %s1428_s20, %s30_s7  }
  0x6e   : > { %p1639_p10 = por %p2089_p8, %p37_p13  ;;  %p39_p5 = por %p38_p4, %p37_p13 }
  0x6f   : > { %s223_s12 = sand.u32 1, %s1428_s20   ;;  %s1096_s9 = smul.u32 1664, %s1432_s21 }
  0x70   : > { %s1095_s13 = smul.u32 104, %s223_s12  ;;  %p1649_p11 = pnand %p1145_p3, %p39_p5 }
  0x71   : > { %s1656_s8 = scalar_lea.hbm %s2074_s0, %s1096_s9  ;;  %s1660_s30 = scalar_lea.sflag [#allocation3], %s223_s12 }
  0x72   : > { %s227_s6 = scalar_lea.vmem [#allocation2], %s1095_s13  ;;  %s1328_s7 = scalar_lea.hbm %s1656_s8, 1664 }
  0x73   : > { %s234_s17 = sshll.u32 %s227_s6, 4  ;;  %p1329_p7 = scmp.ne.s32.totalorder %s1656_s8, %s1328_s7  ;;  %s1658_s17 = int_to_ptr.vmem [resolvable:$true] %s234_s17 }
  0x74   : > { %p1330_p9 = pneg %p1649_p11  ;;  %s1333_s16 = scalar_lea.hbm %s2074_s0, 3328 }
  0x75   : > { %p1334_p1 = scmp.lt.u32.totalorder %s1656_s8, %s2074_s0  ;;  %p1335_p2 = scmp.lt.u32.totalorder %s1333_s16, %s1328_s7 }
  0x76   : > { %p1331_p12 = pnand %p1330_p9, %p1329_p7  ;;  %p1337_p6 = scmp.lt.u32.totalorder %s1328_s7, %s1656_s8 }
  0x77   : > { %p1336_p13 = por %p1335_p2, %p1334_p1 }
  0x78   : > { %p1332_p0 = pneg %p1331_p12 }
  0x79   : > { %p1338_p4 = por %p1337_p6, %p1336_p13 }
  0x7b   : > { %p1339_p8 = pnand %p1338_p4, %p1332_p0 }
  0x7d   : > { %1342 = shalt.err (!%p1339_p8)
}
  0x7e   : > { %s1343_s12 = scalar_lea.vmem %s1658_s17, 1664  ;;  %s1440_s13 = smov [#allocation2]  }
  0x7f   : > { %p1344_p3 = scmp.ne.s32.totalorder %s1658_s17, %s1343_s12  ;;  %s1348_s6 = sshll.u32 %s1440_s13, 4  ;;  %s1349_s6 = int_to_ptr.vmem [resolvable:$false] %s1348_s6 }
  0x80   : > { %s1350_s23 = scalar_lea.vmem %s1349_s6, 3328  ;;  %p1351_p12 = scmp.lt.s32.totalorder %s1658_s17, %s1349_s6 }
  0x81   : > { %p1346_p5 = pnand %p1344_p3, %p1330_p9  ;;  %p1352_p1 = scmp.lt.s32.totalorder %s1350_s23, %s1343_s12 }
  0x83   : > { %p1347_p7 = pneg %p1346_p5  ;;  %p1353_p2 = por %p1352_p1, %p1351_p12 }
  0x85   : > { %p1354_p13 = pnand %p1353_p2, %p1347_p7 }
  0x87   : > { %1357 = shalt.err (!%p1354_p13)
}
  0x88   : > { %s2092_s7 = smov 64   ;;  %p2093_p9 = scmp.ne.s32.totalorder %s2086_s26, 0 }
  0x89   : > { %1136 = dma.hbm_to_vmem [thread:$0]  (!%p1649_p11), %s1656_s8, 1664, %s1658_s17, %s1660_s30, %s2092_s7, %s2092_s7, %s1438_s27  }
  0x8a   : > { %246 = sbr.rel (%p2093_p9) target bundleno = 556 (0x22c), region = 40  ;;  %s1694_s29 = sand.u32 (!%p2093_p9), 1, %s1424_s19  }
  0x8b   : > { %s1097_s9 = smul.u32 (!%p2093_p9), 104, %s1694_s29  ;;  %s249_s16 = scalar_lea.sflag (!%p2093_p9), [#allocation3], %s1694_s29 }
  0x8c   : > { %p2094_p0 = scmp.ne.s32.totalorder (!%p2093_p9), %s2084_s24, 0 }
  0x8d   : > { %s1698_s28 = scalar_lea.vmem (!%p2093_p9), [#allocation2], %s1097_s9 }
  0x91   : > { %1403 = dma.done.wait (%p2094_p0), %s249_s16, 1664  }
  0x92   : > { %1405 = vsyncadd (%p2094_p0), %s249_s16, 4294965632  ;;  %p2095_p11 = scmp.eq.s32.totalorder %s1497_s22, 0 }
  0x94   : > { %1407 = dma.done.wait (%p2095_p11), [#allocation6], 1040   ;;  %p2096_p6 = pmov %p2095_p11 }
  0x96   : > { %1409 = vsyncadd (%p2096_p6), [#allocation6], 4294966256  ;;  %p2097_p4 = pmov %p2096_p6 }
  0x98   : > { %1411 = dma.done.wait (%p2097_p4), [#allocation9], 32   ;;  %p2098_p8 = pmov %p2097_p4 }
  0x99   : > { %v1441_v0 = vmov 0.0   ;;  %vm1442_vm0 = vmmov 0   ;;  %v1193_v1 = vld [vmem:[#allocation5] sm:$0xff]   ;;  %v1194_v2 = vld [vmem:[#allocation5 + $0x8] sm:$0xff]   ;;  %v1195_v3 = vld [vmem:[#allocation5 + $0x10] sm:$0xff]   ;;  %v340_v22 = vlaneseq  ;;  %s1098_s24 = smul.u32 208, %s1694_s29 }
  0x9a   : > { %1413 = vsyncadd (%p2098_p8), [#allocation9], 4294967264  ;;  %1011 = vmatprep.subr.bf16.mxu0 %v1441_v0  ;;  %1079 = vmatprep.subr.bf16.mxu1 %v1441_v0  ;;  %v1196_v4 = vld [vmem:[#allocation5 + $0x18] sm:$0xff]   ;;  %v1197_v5 = vld [vmem:[#allocation5 + $0x20] sm:$0xff]   ;;  %s1099_s27 = smul.u32 3328, %s1497_s22  ;;  %s829_s22 = scalar_lea.sflag [#allocation4], %s1694_s29 }
  0x9b   : > { %1027 = vmatprep.mubr.msk.bf16.mxu0 %vm1442_vm0, %v1441_v0  ;;  %1055 = vmatprep.mubr.msk.bf16.mxu1 %vm1442_vm0, %v1441_v0  ;;  %v1198_v6 = vld [vmem:[#allocation5 + $0x28] sm:$0xff]   ;;  %v1199_v7 = vld [vmem:[#allocation5 + $0x30] sm:$0xff]   ;;  %v1200_v8 = vld [vmem:[#allocation5 + $0x38] sm:$0xff]   ;;  %v341_v29 = vshrl.u32 %v340_v22, 7  ;;  %s1993_s26 = scalar_lea.vmem [#allocation11], %s1098_s24  ;;  %s1443_s13 = smov [#allocation11]  }
  0x9c   : > { %1012 = vmatpush3.bf16.msra.mxu0 %v1193_v1  ;;  %1087 = vmatpush3.bf16.msra.mxu1 %v1193_v1  ;;  %v1201_v9 = vld [vmem:[%s1698_s28] sm:$0xff]   ;;  %v1205_v10 = vld [vmem:[%s1698_s28 + $0x38] sm:$0xff]   ;;  %v1202_v11 = vld [vmem:[%s1698_s28 + $0x8] sm:$0xff]   ;;  %s842_s15 = sshll.u32 %s1993_s26, 4  ;;  %s2016_s30 = scalar_lea.hbm %s2079_s5, %s1099_s27  ;;  %s2018_s15 = int_to_ptr.vmem [resolvable:$true] %s842_s15 }
  0x9d   : > { %1013 = vmatprep.subr.bf16.mxu0 %v1441_v0  ;;  %1080 = vmatprep.subr.bf16.mxu1 %v1441_v0  ;;  %v1207_v12 = vld [vmem:[%s1698_s28 + $0x40] sm:$0xff]   ;;  %v1203_v13 = vld [vmem:[%s1698_s28 + $0x10] sm:$0xff]   ;;  %v1209_v14 = vld [vmem:[%s1698_s28 + $0x48] sm:$0xff]   ;;  %v1771_v32 = vsub.s32 0, %v341_v29  ;;  %s1358_s12 = scalar_lea.vmem %s2018_s15, 3328  ;;  %s1362_s6 = sshll.u32 %s1443_s13, 4  ;;  %s1363_s6 = int_to_ptr.vmem [resolvable:$false] %s1362_s6 }
  0x9e   : > { %v1204_v15 = vld [vmem:[%s1698_s28 + $0x18] sm:$0xff]   ;;  %v1211_v16 = vld [vmem:[%s1698_s28 + $0x50] sm:$0xff]   ;;  %v1206_v17 = vld [vmem:[%s1698_s28 + $0x20] sm:$0xff]   ;;  %p1359_p3 = scmp.ne.s32.totalorder %s2018_s15, %s1358_s12  ;;  %s1364_s23 = scalar_lea.vmem %s1363_s6, 6656 }
  0x9f   : > { %v1212_v18 = vld [vmem:[%s1698_s28 + $0x58] sm:$0xff]   ;;  %v1208_v19 = vld [vmem:[%s1698_s28 + $0x28] sm:$0xff]   ;;  %v1213_v20 = vld [vmem:[%s1698_s28 + $0x60] sm:$0xff]   ;;  %p1365_p12 = scmp.lt.s32.totalorder %s2018_s15, %s1363_s6  ;;  %p1366_p1 = scmp.lt.s32.totalorder %s1364_s23, %s1358_s12 }
  0xa0   : > { %1014 = vmatpush3.bf16.msra.mxu0 %v1194_v2  ;;  %1088 = vmatpush3.bf16.msra.mxu1 %v1194_v2  ;;  %v1210_v21 = vld [vmem:[%s1698_s28 + $0x30] sm:$0xff]   ;;  %p1360_p5 = pnand %p1359_p3, %p1639_p10 }
  0xa1   : > { %1015 = vmatprep.subr.bf16.mxu0 %v1441_v0  ;;  %1081 = vmatprep.subr.bf16.mxu1 %v1441_v0  ;;  %v1773_v33 = vld [vmem:[#allocation7] sm:$0x1]  ;;  %p1367_p2 = por %p1366_p1, %p1365_p12 }
  0xa2   : > { %v1781_v40 = vrot.slane %v1773_v33, %v1771_v32  ;;  %p1361_p7 = pneg %p1360_p5 }
  0xa4   : > { %1016 = vmatpush3.bf16.msra.mxu0 %v1195_v3  ;;  %1089 = vmatpush3.bf16.msra.mxu1 %v1195_v3  ;;  %p1368_p13 = pnand %p1367_p2, %p1361_p7 }
  0xa5   : > { %1017 = vmatprep.subr.bf16.mxu0 %v1441_v0  ;;  %1082 = vmatprep.subr.bf16.mxu1 %v1441_v0 }
  0xa8   : > { %1018 = vmatpush3.bf16.msra.mxu0 %v1196_v4  ;;  %1090 = vmatpush3.bf16.msra.mxu1 %v1196_v4 }
  0xa9   : > { %1019 = vmatprep.subr.bf16.mxu0 %v1441_v0  ;;  %1083 = vmatprep.subr.bf16.mxu1 %v1441_v0 }
  0xac   : > { %1020 = vmatpush3.bf16.msra.mxu0 %v1197_v5  ;;  %1091 = vmatpush3.bf16.msra.mxu1 %v1197_v5 }
  0xad   : > { %1021 = vmatprep.subr.bf16.mxu0 %v1441_v0  ;;  %1084 = vmatprep.subr.bf16.mxu1 %v1441_v0 }
  0xb0   : > { %1022 = vmatpush3.bf16.msra.mxu0 %v1198_v6  ;;  %1092 = vmatpush3.bf16.msra.mxu1 %v1198_v6 }
  0xb1   : > { %1023 = vmatprep.subr.bf16.mxu0 %v1441_v0  ;;  %1085 = vmatprep.subr.bf16.mxu1 %v1441_v0 }
  0xb4   : > { %1024 = vmatpush3.bf16.msra.mxu0 %v1199_v7  ;;  %1093 = vmatpush3.bf16.msra.mxu1 %v1199_v7 }
  0xb5   : > { %1025 = vmatprep.subr.bf16.mxu0 %v1441_v0  ;;  %1086 = vmatprep.subr.bf16.mxu1 %v1441_v0 }
  0xb8   : > { %1026 = vmatpush3.bf16.msra.mxu0 %v1200_v8  ;;  %1094 = vmatpush3.bf16.msra.mxu1 %v1200_v8 }
  0xbb   : > { %1028 = vmatmul.mubr.bf16.vlgmr.msra.gmra.mrb[0].mxu0 %v1201_v9  ;;  %1056 = vmatmul.mubr.bf16.vlgmr.msra.gmra.mrb[0].mxu1 %v1205_v10 }
  0xbc   : > { %1031 = vmatprep.mubr.msk.bf16.mxu0 %vm1442_vm0, %v1441_v0  ;;  %1059 = vmatprep.mubr.msk.bf16.mxu1 %vm1442_vm0, %v1441_v0 }
  0xc3   : > { %1032 = vmatmul.mubr.bf16.gmra.mrb[4].mxu0 %v1202_v11  ;;  %1060 = vmatmul.mubr.bf16.gmra.mrb[4].mxu1 %v1207_v12 }
  0xc4   : > { %1035 = vmatprep.mubr.msk.bf16.mxu0 %vm1442_vm0, %v1441_v0  ;;  %1063 = vmatprep.mubr.msk.bf16.mxu1 %vm1442_vm0, %v1441_v0 }
  0xcb   : > { %1036 = vmatmul.mubr.bf16.gmra.mrb[8].mxu0 %v1203_v13  ;;  %1064 = vmatmul.mubr.bf16.gmra.mrb[8].mxu1 %v1209_v14 }
  0xcc   : > { %1039 = vmatprep.mubr.msk.bf16.mxu0 %vm1442_vm0, %v1441_v0  ;;  %1067 = vmatprep.mubr.msk.bf16.mxu1 %vm1442_vm0, %v1441_v0 }
  0xd3   : > { %1040 = vmatmul.mubr.bf16.gmra.mrb[12].mxu0 %v1204_v15  ;;  %1068 = vmatmul.mubr.bf16.gmra.mrb[12].mxu1 %v1211_v16 }
  0xd4   : > { %1043 = vmatprep.mubr.msk.bf16.mxu0 %vm1442_vm0, %v1441_v0  ;;  %1071 = vmatprep.mubr.msk.bf16.mxu1 %vm1442_vm0, %v1441_v0 }
  0xdb   : > { %1044 = vmatmul.mubr.bf16.gmra.mrb[16].mxu0 %v1206_v17  ;;  %1072 = vmatmul.mubr.bf16.gmra.mrb[16].mxu1 %v1212_v18 }
  0xdc   : > { %1047 = vmatprep.mubr.msk.bf16.mxu0 %vm1442_vm0, %v1441_v0  ;;  %1075 = vmatprep.mubr.msk.bf16.mxu1 %vm1442_vm0, %v1441_v0 }
  0xe3   : > { %1048 = vmatmul.mubr.bf16.gmra.mrb[20].mxu0 %v1208_v19  ;;  %1076 = vmatmul.mubr.bf16.gmra.mrb[20].mxu1 %v1213_v20 }
  0xe4   : > { %1051 = vmatprep.mubr.msk.bf16.mxu0 %vm1442_vm0, %v1441_v0 }
  0xeb   : > { %1052 = vmatmul.mubr.bf16.gmra.mrb[24].mxu0 %v1210_v21 }
 0x18e   : > { %v505_v23 = vpop.f32.mrb[0].mxu0  ;;  %v1767_v24 = vpop.f32.mrb[0].mxu1 }
 0x18f   : > { %v1029_v25 = vpop.f32.mrb[1].mxu0  ;;  %v1057_v26 = vpop.f32.mrb[1].mxu1  ;;  %v1787_v44 = vadd.f32 %v505_v23, %v1781_v40 }
 0x190   : > { %v508_v27 = vpop.f32.mrb[2].mxu0  ;;  %v1769_v28 = vpop.f32.mrb[2].mxu1 }
 0x191   : > { %v1030_v30 = vpop.f32.mrb[3].mxu0  ;;  %v1058_v31 = vpop.f32.mrb[3].mxu1  ;;  %v1784_v43 = vadd.f32 %v508_v27, %v1781_v40  ;;  %v639_v53 = vmul.f32 %v1787_v44, %v1787_v44 }
 0x193   : > { %v640_v48 = vmul.f32 %v1784_v43, %v1784_v43  ;;  %v608_v54 = vadd.f32 %v1784_v43, %v1787_v44 }
 0x195   : > { %v665_v59 = vadd.f32 %v640_v48, %v639_v53 }
 0x196   : > { %v513_v34 = vpop.f32.mrb[4].mxu0  ;;  %v1775_v35 = vpop.f32.mrb[4].mxu1 }
 0x197   : > { %v1033_v36 = vpop.f32.mrb[5].mxu0  ;;  %v1061_v37 = vpop.f32.mrb[5].mxu1  ;;  %v1790_v45 = vadd.f32 %v513_v34, %v1781_v40 }
 0x198   : > { %v516_v38 = vpop.f32.mrb[6].mxu0  ;;  %v1777_v39 = vpop.f32.mrb[6].mxu1 }
 0x199   : > { %v1034_v41 = vpop.f32.mrb[7].mxu0  ;;  %v1062_v42 = vpop.f32.mrb[7].mxu1  ;;  %v641_v55 = vmul.f32 %v1790_v45, %v1790_v45  ;;  %v1805_v56 = vadd.f32 %v516_v38, %v1781_v40  ;;  %v609_v60 = vadd.f32 %v608_v54, %v1790_v45 }
 0x19b   : > { %v666_v62 = vadd.f32 %v665_v59, %v641_v55  ;;  %v642_v63 = vmul.f32 %v1805_v56, %v1805_v56  ;;  %v610_v2 = vadd.f32 %v609_v60, %v1805_v56 }
 0x19d   : > { %v667_v9 = vadd.f32 %v666_v62, %v642_v63 }
 0x19e   : > { %v521_v46 = vpop.f32.mrb[8].mxu0  ;;  %v1792_v47 = vpop.f32.mrb[8].mxu1 }
 0x19f   : > { %v1037_v49 = vpop.f32.mrb[9].mxu0  ;;  %v1065_v50 = vpop.f32.mrb[9].mxu1  ;;  %v1809_v61 = vadd.f32 %v521_v46, %v1781_v40 }
 0x1a0   : > { %v524_v51 = vpop.f32.mrb[10].mxu0  ;;  %v1796_v52 = vpop.f32.mrb[10].mxu1 }
 0x1a1   : > { %v1038_v57 = vpop.f32.mrb[11].mxu0  ;;  %v1066_v58 = vpop.f32.mrb[11].mxu1  ;;  %v643_v3 = vmul.f32 %v1809_v61, %v1809_v61  ;;  %v1819_v4 = vadd.f32 %v524_v51, %v1781_v40  ;;  %v611_v10 = vadd.f32 %v610_v2, %v1809_v61 }
 0x1a3   : > { %v668_v14 = vadd.f32 %v667_v9, %v643_v3  ;;  %v644_v15 = vmul.f32 %v1819_v4, %v1819_v4  ;;  %v612_v16 = vadd.f32 %v611_v10, %v1819_v4 }
 0x1a5   : > { %v669_v21 = vadd.f32 %v668_v14, %v644_v15 }
 0x1a6   : > { %v529_v0 = vpop.f32.mrb[12].mxu0  ;;  %v1813_v1 = vpop.f32.mrb[12].mxu1 }
 0x1a7   : > { %v1041_v5 = vpop.f32.mrb[13].mxu0  ;;  %v1069_v6 = vpop.f32.mrb[13].mxu1  ;;  %v1825_v11 = vadd.f32 %v529_v0, %v1781_v40 }
 0x1a8   : > { %v532_v7 = vpop.f32.mrb[14].mxu0  ;;  %v1821_v8 = vpop.f32.mrb[14].mxu1 }
 0x1a9   : > { %v1042_v12 = vpop.f32.mrb[15].mxu0  ;;  %v1070_v13 = vpop.f32.mrb[15].mxu1  ;;  %v645_v17 = vmul.f32 %v1825_v11, %v1825_v11  ;;  %v1833_v18 = vadd.f32 %v532_v7, %v1781_v40  ;;  %v613_v22 = vadd.f32 %v612_v16, %v1825_v11 }
 0x1aa   : > { %v1876_v13 = vadd.f32 %v1767_v24, %v1781_v40 }
 0x1ab   : > { %v670_v30 = vadd.f32 %v669_v21, %v645_v17  ;;  %v646_v31 = vmul.f32 %v1833_v18, %v1833_v18  ;;  %v614_v37 = vadd.f32 %v613_v22, %v1833_v18  ;;  %v1886_v22 = vadd.f32 %v1769_v28, %v1781_v40 }
 0x1ad   : > { %v671_v42 = vadd.f32 %v670_v30, %v646_v31  ;;  %v1895_v30 = vadd.f32 %v1775_v35, %v1781_v40  ;;  %v654_v28 = vmul.f32 %v1886_v22, %v1886_v22  ;;  %v1909_v35 = vadd.f32 %v1792_v47, %v1781_v40 }
 0x1ae   : > { %v537_v19 = vpop.f32.mrb[16].mxu0  ;;  %v1835_v20 = vpop.f32.mrb[16].mxu1  ;;  %v1923_v47 = vadd.f32 %v1813_v1, %v1781_v40 }
 0x1af   : > { %v1839_v23 = vadd.f32 %v537_v19, %v1781_v40  ;;  %v1045_v25 = vpop.f32.mrb[17].mxu0  ;;  %v1073_v26 = vpop.f32.mrb[17].mxu1 }
 0x1b0   : > { %v540_v27 = vpop.f32.mrb[18].mxu0  ;;  %v1841_v29 = vpop.f32.mrb[18].mxu1 }
 0x1b1   : > { %v1046_v34 = vpop.f32.mrb[19].mxu0  ;;  %v1074_v36 = vpop.f32.mrb[19].mxu1  ;;  %v647_v38 = vmul.f32 %v1839_v23, %v1839_v23  ;;  %v1849_v41 = vadd.f32 %v540_v27, %v1781_v40  ;;  %v615_v46 = vadd.f32 %v614_v37, %v1839_v23  ;;  %v653_v27 = vmul.f32 %v1876_v13, %v1876_v13 }
 0x1b2   : > { %v1902_v36 = vadd.f32 %v1777_v39, %v1781_v40  ;;  %v1916_v39 = vadd.f32 %v1796_v52, %v1781_v40 }
 0x1b3   : > { %v672_v50 = vadd.f32 %v671_v42, %v647_v38  ;;  %v648_v51 = vmul.f32 %v1849_v41, %v1849_v41  ;;  %v616_v59 = vadd.f32 %v615_v46, %v1849_v41  ;;  %v655_v42 = vmul.f32 %v1895_v30, %v1895_v30 }
 0x1b5   : > { %v673_v2 = vadd.f32 %v672_v50, %v648_v51  ;;  %v656_v50 = vmul.f32 %v1902_v36, %v1902_v36 }
 0x1b6   : > { %v545_v48 = vpop.f32.mrb[20].mxu0  ;;  %v1852_v49 = vpop.f32.mrb[20].mxu1 }
 0x1b7   : > { %v1857_v53 = vadd.f32 %v545_v48, %v1781_v40  ;;  %v1049_v54 = vpop.f32.mrb[21].mxu0  ;;  %v1077_v55 = vpop.f32.mrb[21].mxu1 }
 0x1b8   : > { %v548_v57 = vpop.f32.mrb[22].mxu0  ;;  %v1859_v58 = vpop.f32.mrb[22].mxu1  ;;  %v657_v55 = vmul.f32 %v1909_v35, %v1909_v35 }
 0x1b9   : > { %v649_v60 = vmul.f32 %v1857_v53, %v1857_v53  ;;  %v1865_v62 = vadd.f32 %v548_v57, %v1781_v40  ;;  %v1050_v63 = vpop.f32.mrb[23].mxu0  ;;  %v1078_v0 = vpop.f32.mrb[23].mxu1  ;;  %v617_v3 = vadd.f32 %v616_v59, %v1857_v53 }
 0x1ba   : > { %v1931_v0 = vadd.f32 %v1821_v8, %v1781_v40 }
 0x1bb   : > { %v674_v5 = vadd.f32 %v673_v2, %v649_v60  ;;  %v650_v6 = vmul.f32 %v1865_v62, %v1865_v62  ;;  %v618_v9 = vadd.f32 %v617_v3, %v1865_v62  ;;  %v658_v60 = vmul.f32 %v1916_v39, %v1916_v39 }
 0x1bc   : > { %v659_v3 = vmul.f32 %v1923_v47, %v1923_v47  ;;  %v660_v8 = vmul.f32 %v1931_v0, %v1931_v0 }
 0x1bd   : > { %v675_v15 = vadd.f32 %v674_v5, %v650_v6  ;;  %v1938_v5 = vadd.f32 %v1835_v20, %v1781_v40  ;;  %v1942_v6 = vadd.f32 %v1841_v29, %v1781_v40 }
 0x1be   : > { %v553_v7 = vpop.f32.mrb[24].mxu0 }
 0x1bf   : > { %v1872_v10 = vadd.f32 %v553_v7, %v1781_v40  ;;  %v1053_v12 = vpop.f32.mrb[25].mxu0  ;;  %v661_v20 = vmul.f32 %v1938_v5, %v1938_v5  ;;  %v662_v29 = vmul.f32 %v1942_v6, %v1942_v6 }
 0x1c0   : > { %v556_v14 = vpop.f32.mrb[26].mxu0  ;;  %v1949_v12 = vadd.f32 %v1852_v49, %v1781_v40 }
 0x1c1   : > { %v619_v16 = vadd.f32 %v618_v9, %v1872_v10  ;;  %v651_v17 = vmul.f32 %v1872_v10, %v1872_v10  ;;  %v1882_v19 = vadd.f32 %v556_v14, %v1781_v40  ;;  %v1054_v21 = vpop.f32.mrb[27].mxu0 }
 0x1c2   : > { %v663_v21 = vmul.f32 %v1949_v12, %v1949_v12 }
 0x1c3   : > { %v676_v25 = vadd.f32 %v675_v15, %v651_v17  ;;  %v620_v26 = vadd.f32 %v619_v16, %v1882_v19  ;;  %v652_v24 = vmul.f32 %v1882_v19, %v1882_v19 }
 0x1c5   : > { %v621_v31 = vadd.f32 %v620_v26, %v1876_v13  ;;  %v677_v34 = vadd.f32 %v676_v25, %v652_v24  ;;  %v605_v25 = vadd.f32 %v1859_v58, %v1781_v40  ;;  %v696_v40 = vmul.f32 12.0, %v1773_v33 }
 0x1c7   : > { %v622_v37 = vadd.f32 %v621_v31, %v1886_v22  ;;  %v678_v38 = vadd.f32 %v677_v34, %v653_v27  ;;  %v664_v31 = vmul.f32 %v605_v25, %v605_v25 }
 0x1c9   : > { %v623_v46 = vadd.f32 %v622_v37, %v1895_v30  ;;  %v679_v48 = vadd.f32 %v678_v38, %v654_v28 }
 0x1cb   : > { %v680_v51 = vadd.f32 %v679_v48, %v655_v42  ;;  %v624_v54 = vadd.f32 %v623_v46, %v1902_v36 }
 0x1cd   : > { %v625_v57 = vadd.f32 %v624_v54, %v1909_v35  ;;  %v681_v59 = vadd.f32 %v680_v51, %v656_v50  ;;  %v698_v51 = vmul.f32 %v1773_v33, %v1773_v33 }
 0x1cf   : > { %v626_v63 = vadd.f32 %v625_v57, %v1916_v39  ;;  %v682_v52 = vadd.f32 %v681_v59, %v657_v55  ;;  %v699_v59 = vmul.f32 12.0, %v698_v51 }
 0x1d1   : > { %v627_v2 = vadd.f32 %v626_v63, %v1923_v47  ;;  %v683_v1 = vadd.f32 %v682_v52, %v658_v60 }
 0x1d3   : > { %v684_v7 = vadd.f32 %v683_v1, %v659_v3  ;;  %v628_v9 = vadd.f32 %v627_v2, %v1931_v0 }
 0x1d5   : > { %v685_v14 = vadd.f32 %v684_v7, %v660_v8  ;;  %v629_v15 = vadd.f32 %v628_v9, %v1938_v5  ;;  %v707_v8 = vld [vmem:[#allocation8] sm:$0x1] }
 0x1d7   : > { %v686_v16 = vadd.f32 %v685_v14, %v661_v20  ;;  %v630_v17 = vadd.f32 %v629_v15, %v1942_v6  ;;  %v709_v20 = vld [vmem:[#allocation10] sm:$0x1] }
 0x1d9   : > { %v687_v49 = vadd.f32 %v686_v16, %v662_v29  ;;  %v631_v26 = vadd.f32 %v630_v17, %v1949_v12 }
 0x1db   : > { %v688_v24 = vadd.f32 %v687_v49, %v663_v21  ;;  %v632_v27 = vadd.f32 %v631_v26, %v605_v25 }
 0x1dd   : > { %v633_v34 = vrot.slane %v632_v27, 4  ;;  %v689_v28 = vadd.f32 %v688_v24, %v664_v31 }
 0x1df   : > { %v634_v37 = vadd.f32 %v633_v34, %v632_v27  ;;  %v690_v38 = vrot.slane %v689_v28, 4 }
 0x1e1   : > { %v635_v42 = vrot.slane %v634_v37, 2  ;;  %v691_v46 = vadd.f32 %v690_v38, %v689_v28 }
 0x1e3   : > { %v636_v48 = vadd.f32 %v635_v42, %v634_v37  ;;  %v692_v50 = vrot.slane %v691_v46, 2 }
 0x1e5   : > { %v637_v54 = vrot.slane %v636_v48, 1  ;;  %v693_v55 = vadd.f32 %v692_v50, %v691_v46 }
 0x1e7   : > { %v638_v58 = vadd.f32 %v637_v54, %v636_v48  ;;  %v694_v57 = vrot.slane %v693_v55, 1 }
 0x1e9   : > { %v695_v60 = vadd.f32 %v694_v57, %v693_v55  ;;  %v697_v63 = vsub.f32 %v638_v58, %v696_v40 }
 0x1eb   : > { %v700_v52 = vsub.f32 %v695_v60, %v699_v59  ;;  %v701_v2 = vmul.f32 0.0051020407, %v697_v63 }
 0x1ed   : > { %v702_v3 = vmul.f32 0.0051020407, %v700_v52  ;;  %v703_v1 = vmul.f32 %v701_v2, %v701_v2 }
 0x1ef   : > { %v704_v7 = vsub.f32 %v702_v3, %v703_v1 }
 0x1f1   : > { %v705_v9 = vadd.f32 1e-05, %v704_v7 }
 0x1f3   : > { %1214 = vrsqrt.f32 %v705_v9 }
 0x1fd   : > { %v1215_v14 = vpop.eup %1214 }
 0x1fe   : > { %v708_v15 = vmul.f32 %v1215_v14, %v707_v8 }
 0x200   : > { %v710_v29 = vmul.f32 %v708_v15, %v701_v2  ;;  %v716_v33 = vrot.slane %v708_v15, %v1771_v32 }
 0x202   : > { %v711_v16 = vsub.f32 %v709_v20, %v710_v29  ;;  %v743_v17 = vmul.f32 %v716_v33, %v605_v25  ;;  %v718_v21 = vmul.f32 %v716_v33, %v1787_v44  ;;  %v719_v49 = vmul.f32 %v716_v33, %v1784_v43 }
 0x203   : > { %v720_v26 = vmul.f32 %v716_v33, %v1790_v45  ;;  %v721_v24 = vmul.f32 %v716_v33, %v1805_v56  ;;  %v722_v27 = vmul.f32 %v716_v33, %v1809_v61  ;;  %v723_v31 = vmul.f32 %v716_v33, %v1819_v4 }
 0x204   : > { %v748_v34 = vrot.slane %v711_v16, %v1771_v32  ;;  %v724_v28 = vmul.f32 %v716_v33, %v1825_v11  ;;  %v725_v37 = vmul.f32 %v716_v33, %v1833_v18  ;;  %v726_v25 = vmul.f32 %v716_v33, %v1839_v23 }
 0x205   : > { %v727_v44 = vmul.f32 %v716_v33, %v1849_v41  ;;  %v728_v43 = vmul.f32 %v716_v33, %v1857_v53  ;;  %v729_v45 = vmul.f32 %v716_v33, %v1865_v62  ;;  %v730_v56 = vmul.f32 %v716_v33, %v1872_v10 }
 0x206   : > { %v775_v38 = vadd.f32 %v748_v34, %v743_v17  ;;  %v731_v61 = vmul.f32 %v716_v33, %v1882_v19  ;;  %v732_v4 = vmul.f32 %v716_v33, %v1876_v13  ;;  %v733_v32 = vmul.f32 %v716_v33, %v1886_v22 }
 0x207   : > { %v734_v11 = vmul.f32 %v716_v33, %v1895_v30  ;;  %v735_v18 = vmul.f32 %v716_v33, %v1902_v36  ;;  %v736_v23 = vmul.f32 %v716_v33, %v1909_v35  ;;  %v737_v41 = vmul.f32 %v716_v33, %v1916_v39 }
 0x208   : > { %v801_v53 = vmax.f32 %v775_v38, 0.0  ;;  %v738_v62 = vmul.f32 %v716_v33, %v1923_v47  ;;  %v739_v10 = vmul.f32 %v716_v33, %v1931_v0  ;;  %v740_v42 = vmul.f32 %v716_v33, %v1938_v5 }
 0x209   : > { %v741_v19 = vmul.f32 %v716_v33, %v1942_v6  ;;  %v742_v13 = vmul.f32 %v716_v33, %v1949_v12  ;;  %v750_v22 = vadd.f32 %v748_v34, %v718_v21  ;;  %v751_v46 = vadd.f32 %v748_v34, %v719_v49 }
 0x20a   : > { %827 = vst [vmem:[%s1993_s26 + $0xc8] sm:$0xff] %v801_v53  ;;  %v752_v30 = vadd.f32 %v748_v34, %v720_v26  ;;  %v753_v36 = vadd.f32 %v748_v34, %v721_v24  ;;  %v754_v35 = vadd.f32 %v748_v34, %v722_v27  ;;  %v755_v39 = vadd.f32 %v748_v34, %v723_v31 }
 0x20b   : > { %v756_v48 = vadd.f32 %v748_v34, %v724_v28  ;;  %v757_v47 = vadd.f32 %v748_v34, %v725_v37  ;;  %v758_v50 = vadd.f32 %v748_v34, %v726_v25  ;;  %v759_v0 = vadd.f32 %v748_v34, %v727_v44 }
 0x20c   : > { %v760_v51 = vadd.f32 %v748_v34, %v728_v43  ;;  %v761_v5 = vadd.f32 %v748_v34, %v729_v45  ;;  %v762_v54 = vadd.f32 %v748_v34, %v730_v56  ;;  %v763_v6 = vadd.f32 %v748_v34, %v731_v61 }
 0x20d   : > { %v764_v55 = vadd.f32 %v748_v34, %v732_v4  ;;  %v765_v12 = vadd.f32 %v748_v34, %v733_v32  ;;  %v766_v40 = vadd.f32 %v748_v34, %v734_v11  ;;  %v767_v58 = vadd.f32 %v748_v34, %v735_v18 }
 0x20e   : > { %v768_v57 = vadd.f32 %v748_v34, %v736_v23  ;;  %v769_v59 = vadd.f32 %v748_v34, %v737_v41  ;;  %v770_v60 = vadd.f32 %v748_v34, %v738_v62  ;;  %v771_v63 = vadd.f32 %v748_v34, %v739_v10 }
 0x20f   : > { %v772_v52 = vadd.f32 %v748_v34, %v740_v42  ;;  %v773_v2 = vadd.f32 %v748_v34, %v741_v19  ;;  %v774_v3 = vadd.f32 %v748_v34, %v742_v13  ;;  %v776_v1 = vmax.f32 %v750_v22, 0.0 }
 0x210   : > { %v777_v7 = vmax.f32 %v751_v46, 0.0  ;;  %v778_v9 = vmax.f32 %v752_v30, 0.0  ;;  %v779_v8 = vmax.f32 %v753_v36, 0.0  ;;  %v780_v14 = vmax.f32 %v754_v35, 0.0 }
 0x211   : > { %v781_v15 = vmax.f32 %v755_v39, 0.0  ;;  %v782_v20 = vmax.f32 %v756_v48, 0.0  ;;  %v783_v29 = vmax.f32 %v757_v47, 0.0  ;;  %v784_v33 = vmax.f32 %v758_v50, 0.0  ;;  %802 = vst [vmem:[%s1993_s26] sm:$0xff] %v776_v1 }
 0x212   : > { %v785_v16 = vmax.f32 %v759_v0, 0.0  ;;  %v786_v17 = vmax.f32 %v760_v51, 0.0  ;;  %v787_v21 = vmax.f32 %v761_v5, 0.0  ;;  %v788_v49 = vmax.f32 %v762_v54, 0.0  ;;  %803 = vst [vmem:[%s1993_s26 + $0x8] sm:$0xff] %v777_v7  ;;  %804 = vst [vmem:[%s1993_s26 + $0x10] sm:$0xff] %v778_v9 }
 0x213   : > { %805 = vst [vmem:[%s1993_s26 + $0x18] sm:$0xff] %v779_v8  ;;  %806 = vst [vmem:[%s1993_s26 + $0x20] sm:$0xff] %v780_v14  ;;  %v789_v26 = vmax.f32 %v763_v6, 0.0  ;;  %v790_v24 = vmax.f32 %v764_v55, 0.0  ;;  %v791_v27 = vmax.f32 %v765_v12, 0.0  ;;  %v792_v31 = vmax.f32 %v766_v40, 0.0 }
 0x214   : > { %807 = vst [vmem:[%s1993_s26 + $0x28] sm:$0xff] %v781_v15  ;;  %808 = vst [vmem:[%s1993_s26 + $0x30] sm:$0xff] %v782_v20  ;;  %v793_v34 = vmax.f32 %v767_v58, 0.0  ;;  %v794_v28 = vmax.f32 %v768_v57, 0.0  ;;  %v795_v37 = vmax.f32 %v769_v59, 0.0  ;;  %v796_v25 = vmax.f32 %v770_v60, 0.0 }
 0x215   : > { %809 = vst [vmem:[%s1993_s26 + $0x38] sm:$0xff] %v783_v29  ;;  %810 = vst [vmem:[%s1993_s26 + $0x40] sm:$0xff] %v784_v33  ;;  %v797_v44 = vmax.f32 %v771_v63, 0.0  ;;  %v798_v43 = vmax.f32 %v772_v52, 0.0  ;;  %v799_v45 = vmax.f32 %v773_v2, 0.0  ;;  %v800_v56 = vmax.f32 %v774_v3, 0.0 }
 0x216   : > { %811 = vst [vmem:[%s1993_s26 + $0x48] sm:$0xff] %v785_v16  ;;  %812 = vst [vmem:[%s1993_s26 + $0x50] sm:$0xff] %v786_v17 }
 0x217   : > { %813 = vst [vmem:[%s1993_s26 + $0x58] sm:$0xff] %v787_v21  ;;  %814 = vst [vmem:[%s1993_s26 + $0x60] sm:$0xff] %v788_v49 }
 0x218   : > { %815 = vst [vmem:[%s1993_s26 + $0x68] sm:$0xff] %v789_v26  ;;  %816 = vst [vmem:[%s1993_s26 + $0x70] sm:$0xff] %v790_v24 }
 0x219   : > { %817 = vst [vmem:[%s1993_s26 + $0x78] sm:$0xff] %v791_v27  ;;  %818 = vst [vmem:[%s1993_s26 + $0x80] sm:$0xff] %v792_v31 }
 0x21a   : > { %819 = vst [vmem:[%s1993_s26 + $0x88] sm:$0xff] %v793_v34  ;;  %820 = vst [vmem:[%s1993_s26 + $0x90] sm:$0xff] %v794_v28 }
 0x21b   : > { %821 = vst [vmem:[%s1993_s26 + $0x98] sm:$0xff] %v795_v37  ;;  %822 = vst [vmem:[%s1993_s26 + $0xa0] sm:$0xff] %v796_v25 }
 0x21c   : > { %823 = vst [vmem:[%s1993_s26 + $0xa8] sm:$0xff] %v797_v44  ;;  %824 = vst [vmem:[%s1993_s26 + $0xb0] sm:$0xff] %v798_v43 }
 0x21d   : > { %825 = vst [vmem:[%s1993_s26 + $0xb8] sm:$0xff] %v799_v45  ;;  %826 = vst [vmem:[%s1993_s26 + $0xc0] sm:$0xff] %v800_v56 }
 0x21e   : > { %1371 = shalt.err (!%p1368_p13)
}
 0x21f   : > { %s1372_s7 = scalar_lea.hbm %s2016_s30, 3328  ;;  %s1376_s28 = scalar_lea.hbm %s2079_s5, 6656 }
 0x220   : > { %p1373_p9 = scmp.ne.s32.totalorder %s2016_s30, %s1372_s7  ;;  %p1377_p6 = scmp.lt.u32.totalorder %s2016_s30, %s2079_s5 }
 0x221   : > { %p1378_p4 = scmp.lt.u32.totalorder %s1376_s28, %s1372_s7  ;;  %p1380_p3 = scmp.lt.u32.totalorder %s1372_s7, %s2016_s30 }
 0x222   : > { %p1374_p0 = pnand %p1373_p9, %p1639_p10 }
 0x223   : > { %p1379_p8 = por %p1378_p4, %p1377_p6 }
 0x224   : > { %p1375_p11 = pneg %p1374_p0 }
 0x225   : > { %p1381_p5 = por %p1380_p3, %p1379_p8 }
 0x227   : > { %p1382_p7 = pnand %p1381_p5, %p1375_p11 }
 0x229   : > { %1385 = shalt.err (!%p1382_p7)
}
 0x22a   : > { %s1444_s27 = smov 128   ;;  %s1445_s8 = smov 8  }
 0x22b   : > { %1118 = dma.vmem_to_hbm [thread:$0]  (%p1639_p10), %s2018_s15, 3328, %s2016_s30, %s829_s22, %s1444_s27, %s1444_s27, %s1445_s8  }
 0x22c PF: > { %s857_s17 = sand.u32 1, %s1420_s18   ;;  %p2099_p12 = scmp.ne.s32.totalorder %s2085_s25, 0 }
 0x22d   : > { %p2100_p1 = scmp.ge.s32.totalorder %s1432_s21, 2  ;;  %s858_s12 = scalar_lea.sflag [#allocation4], %s857_s17 }
 0x22f   : > { %p1138_p2 = pnand %p2100_p1, %p2099_p12 }
 0x231   : > { %1415 = dma.done.wait (!%p1138_p2), %s858_s12, 3328  }
 0x232   : > { %1417 = vsyncadd (!%p1138_p2), %s858_s12, 4294963968  ;;  %p20_p13 = scmp.ge.s32.totalorder %s1629_s14, 4   ;;  %s2101_s18 = smov %s1424_s19 }
 0x233   : > { %s2102_s19 = smov %s1428_s20  ;;  %s2103_s20 = smov %s1645_s11 }
 0x234   : > { %s2104_s21 = smov %s1629_s14  ;;  %22 = sbr.rel (!%p20_p13) target bundleno = 7 (0x7), region = 101 }
 0x23b   :  { %863 = vsyncpa [#allocation3], 1 }
 0x23c   :  { %865 = vsyncpa [#allocation3 + $0x1], 1 }
 0x23d   :  { %866 = vsyncpa [#allocation6], 1 }
 0x23e   :  { %867 = vsyncpa [#allocation9], 1 }
 0x23f   :  { %868 = vsyncpa [#allocation4], 1 }
 0x240   :  { %870 = vsyncpa [#allocation4 + $0x1], 1 }

</bundles_post_ra>
